<compile_context>
chip_gen: v7x
topology: tpu7x:2x2x1
jax: 0.10.0
libtpu: 0.0.40
codegen_flags: <defaults>
</compile_context>

<pallas_src>
import functools

import jax
import jax.numpy as jnp
from jax.experimental import pallas as pl
from jax.experimental.pallas import tpu as pltpu


def open_layer_kernel(p_ref, w_ref, b_ref, o_ref, *, PH, PW):
    # p_ref : (4, BB, R, K) bf16  phase-decomposed im2col patches
    #         phase 0 -> conv(2ph,   2pw), 1 -> conv(2ph,   2pw+1)
    #         phase 2 -> conv(2ph+1, 2pw), 3 -> conv(2ph+1, 2pw+1)
    # w_ref : (K, CP)  bf16  BN-folded conv weight (resident across the grid)
    # b_ref : (1, CP)  f32   BN-folded bias        (resident across the grid)
    # o_ref : (BB*R, CP) f32 max-pooled output, row = b_local*R + ph*PW + pw
    R = PH * PW
    _, BB, _, K = p_ref.shape
    M1 = BB * R

    # Single fused MXU matmul over all 4 phases x BB images (M = 4*BB*R),
    # f32 accumulation; folded BN bias + ReLU applied once.
    p = p_ref[...].reshape(4 * M1, K)          # leading-dim merge (R % 8 == 0)
    y = jnp.dot(p, w_ref[...], preferred_element_type=jnp.float32)
    y = jnp.maximum(y + b_ref[...], 0.0)       # (4*M1, CP) f32, post-ReLU >= 0

    e_ee = y[0 * M1:1 * M1]                    # conv(2ph,   2pw)
    e_eo = y[1 * M1:2 * M1]                    # conv(2ph,   2pw+1)
    e_oe = y[2 * M1:3 * M1]                    # conv(2ph+1, 2pw)
    e_oo = y[3 * M1:4 * M1]                    # conv(2ph+1, 2pw+1)

    # Masks kill rows that wrap across the pool's top/left padding (and across
    # image boundaries in the flattened BB*R slab). Post-ReLU values are >= 0,
    # so zero-fill is equivalent to -inf pool padding.
    row = jax.lax.broadcasted_iota(jnp.int32, (M1, 1), 0)
    wmask = (row % PW != 0).astype(jnp.float32)        # pw == 0 -> 0
    hmask = ((row % R) >= PW).astype(jnp.float32)      # ph == 0 -> 0

    def shift_w(a):        # value at (ph, pw-1); zeroed at pw == 0
        return pltpu.roll(a, shift=1, axis=0) * wmask

    def shift_h(a):        # value at (ph-1, pw); zeroed at ph == 0
        return pltpu.roll(a, shift=PW, axis=0) * hmask

    eo_w = shift_w(e_eo)   # conv(2ph,   2pw-1)
    oo_w = shift_w(e_oo)   # conv(2ph+1, 2pw-1)

    pooled = e_ee
    for term in (e_eo, e_oe, e_oo, eo_w, oo_w,
                 shift_h(e_oe),    # conv(2ph-1, 2pw)
                 shift_h(e_oo),    # conv(2ph-1, 2pw+1)
                 shift_h(oo_w)):   # conv(2ph-1, 2pw-1)
        pooled = jnp.maximum(pooled, term)
    o_ref[...] = pooled


def _pick_batch_block(B, R, K, CP, max_bb=16, vmem_budget=20 << 20):
    """Largest batch block that double-buffers under budget and keeps >=2 steps."""
    in_bytes = 4 * R * K * 2       # bf16 patches per image (4 phases)
    out_bytes = R * CP * 4         # f32 pooled output per image
    bb = 1
    for cand in range(1, min(B, max_bb) + 1):
        if B % cand:
            continue
        if B >= 2 and B // cand < 2:
            continue               # keep both v7x TensorCores busy
        if 2 * cand * (in_bytes + out_bytes) > vmem_budget:
            continue
        bb = cand
    return bb


def open_layer_forward(x_nchw, conv_w, gamma, beta, running_mean, running_var,
                       eps=1e-5):
    """OpenLayer forward (eval-mode BN). x_nchw: (B, 3, H, W) -> (B, C, PH, PW)."""
    B, Cin, H, W = x_nchw.shape
    Cout, Cin_w, KH, KW = conv_w.shape
    assert Cin == Cin_w == 3 and KH == 7 and KW == 7
    S, P = 2, 3
    OH = (H + 2 * P - KH) // S + 1
    OW = (W + 2 * P - KW) // S + 1
    # Phase-decomposed pool assumes an even conv output size
    # (true for Tiny ImageNet 64x64 -> 32x32 and the test shape below).
    assert OH % 2 == 0 and OW % 2 == 0
    PH, PW = OH // 2, OW // 2          # MaxPool2d(3, stride=2, pad=1) output
    R = PH * PW
    assert R % 8 == 0, "pool rows per image must be sublane-aligned"

    K = KH * KW * Cin                  # 147, left unpadded (MXU pads in-vreg)
    CP = pl.cdiv(Cout, 128) * 128      # lane-dense output channels

    # ---- plain-JAX glue: NHWC bf16, spatial pad, im2col taps (kh, kw, cin) ----
    x = jnp.transpose(x_nchw, (0, 2, 3, 1)).astype(jnp.bfloat16)
    x = jnp.pad(x, ((0, 0), (P, P), (P, P), (0, 0)))
    taps = [x[:, kh:kh + S * OH:S, kw:kw + S * OW:S, :]
            for kh in range(KH) for kw in range(KW)]
    patches = jnp.concatenate(taps, axis=-1)                    # (B, OH, OW, K)
    # Phase-decompose the conv output grid (even/odd rows x even/odd cols),
    # phase-major so each phase is one contiguous matmul slab inside the kernel.
    phases = [patches[:, a::2, b::2, :].reshape(B, R, K)
              for (a, b) in ((0, 0), (0, 1), (1, 0), (1, 1))]
    patches4 = jnp.stack(phases, axis=0)                        # (4, B, R, K) bf16

    # ---- fold eval-mode BatchNorm into the conv weight / bias ----
    scale = gamma / jnp.sqrt(running_var + eps)                 # (Cout,)
    shift = beta - running_mean * scale                         # (Cout,)
    w_flat = jnp.transpose(conv_w, (2, 3, 1, 0)).reshape(K, Cout)
    w_fold = jnp.pad(w_flat * scale[None, :],
                     ((0, 0), (0, CP - Cout))).astype(jnp.bfloat16)   # (K, CP)
    b_fold = jnp.pad(shift, (0, CP - Cout)).reshape(1, CP).astype(jnp.float32)

    BB = _pick_batch_block(B, R, K, CP)
    G = B // BB
    M1 = BB * R

    flops = 2 * B * 4 * R * K * CP + 14 * B * R * CP
    bytes_accessed = (4 * B * R * K) * 2 + K * CP * 2 + CP * 4 + B * R * CP * 4

    kernel = functools.partial(open_layer_kernel, PH=PH, PW=PW)
    out = pl.pallas_call(
        kernel,
        out_shape=jax.ShapeDtypeStruct((B * R, CP), jnp.float32),
        grid=(G,),
        in_specs=[
            pl.BlockSpec((4, BB, R, K), lambda g: (0, g, 0, 0)),
            pl.BlockSpec((K, CP), lambda g: (0, 0)),    # resident folded weight
            pl.BlockSpec((1, CP), lambda g: (0, 0)),    # resident folded bias
        ],
        out_specs=pl.BlockSpec((M1, CP), lambda g: (g, 0)),
        compiler_params=pltpu.CompilerParams(
            dimension_semantics=("parallel",),
            vmem_limit_bytes=32 * 1024 * 1024),
        cost_estimate=pl.CostEstimate(flops=int(flops), transcendentals=0,
                                      bytes_accessed=int(bytes_accessed)),
    )(patches4, w_fold, b_fold)

    out = out.reshape(B, PH, PW, CP)[:, :, :, :Cout]            # drop channel pad
    # NOTE: returning NHWC (skipping this transpose) is cheaper if the consumer
    # accepts channels-last; kept here to match the PyTorch module's layout.
    return jnp.transpose(out, (0, 3, 1, 2))                     # NCHW


def reference_forward(x_nchw, conv_w, gamma, beta, running_mean, running_var,
                      eps=1e-5):
    """Plain-JAX f32 reference: conv -> eval-mode BN -> ReLU -> maxpool."""
    y = jax.lax.conv_general_dilated(
        x_nchw, conv_w, window_strides=(2, 2), padding=((3, 3), (3, 3)),
        dimension_numbers=("NCHW", "OIHW", "NCHW"),
        precision=jax.lax.Precision.HIGHEST)
    scale = (gamma / jnp.sqrt(running_var + eps))[None, :, None, None]
    shift = (beta - running_mean * gamma / jnp.sqrt(running_var + eps))[None, :, None, None]
    y = jnp.maximum(y * scale + shift, 0.0)
    return jax.lax.reduce_window(
        y, -jnp.inf, jax.lax.max,
        window_dimensions=(1, 1, 3, 3), window_strides=(1, 1, 2, 2),
        padding=((0, 0), (0, 0), (1, 1), (1, 1)))


if __name__ == "__main__":
    key = jax.random.PRNGKey(0)
    kx, kw, kg, kb, km, kv = jax.random.split(key, 6)

    B, Cin, H, W = 2, 3, 16, 16
    channels = 8                       # OpenLayer(channels=8)

    x = jax.random.normal(kx, (B, Cin, H, W), dtype=jnp.float32)
    conv_w = jax.random.normal(kw, (channels, Cin, 7, 7), dtype=jnp.float32) * 0.1
    gamma = jax.random.uniform(kg, (channels,), minval=0.5, maxval=1.5)
    beta = jax.random.normal(kb, (channels,), dtype=jnp.float32) * 0.1
    running_mean = jax.random.normal(km, (channels,), dtype=jnp.float32) * 0.1
    running_var = jax.random.uniform(kv, (channels,), minval=0.5, maxval=1.5)

    out = open_layer_forward(x, conv_w, gamma, beta, running_mean, running_var)
    out = jax.block_until_ready(out)

    ref = reference_forward(x, conv_w, gamma, beta, running_mean, running_var)
    assert out.shape == ref.shape == (B, channels, 4, 4), (out.shape, ref.shape)
    # Tolerance accounts for bf16 quantization of patches/weights (accumulation
    # is in f32); reference is full f32.
    assert jnp.allclose(out, ref, atol=3e-2, rtol=3e-2), (
        float(jnp.max(jnp.abs(out - ref))))

    print("KERNEL_OK")
</pallas_src>

<mosaic_0001>
module attributes {stable_mosaic.version = 11 : i64} {
  func.func @open_layer_kernel(%arg0: i32, %arg1: memref<4x1x16x147xbf16, #tpu.memory_space<vmem>>, %arg2: memref<147x128xbf16, #tpu.memory_space<vmem>>, %arg3: memref<1x128xf32, #tpu.memory_space<vmem>>, %arg4: memref<16x128xf32, #tpu.memory_space<vmem>>) attributes {dimension_semantics = [#tpu.dimension_semantics<parallel>], iteration_bounds = array<i64: 2>, scalar_prefetch = 0 : i64, scratch_operands = 0 : i64, tpu.core_type = #tpu.core_type<tc>, window_params = [{transform_indices = @transform_0, window_bounds = array<i64: 4, 1, 16, 147>}, {pipeline_mode = #tpu.pipeline_mode<synchronous>, transform_indices = @transform_1, window_bounds = array<i64: 147, 128>}, {pipeline_mode = #tpu.pipeline_mode<synchronous>, transform_indices = @transform_2, window_bounds = array<i64: 1, 128>}, {transform_indices = @transform_3, window_bounds = array<i64: 16, 128>}]} {
    %c0 = arith.constant 0 : index
    %c0_0 = arith.constant 0 : index
    %c0_1 = arith.constant 0 : index
    %c0_2 = arith.constant 0 : index
    %0 = vector.load %arg1[%c0, %c0_0, %c0_1, %c0_2] : memref<4x1x16x147xbf16, #tpu.memory_space<vmem>>, vector<4x1x16x147xbf16>
    %1 = vector.shape_cast %0 : vector<4x1x16x147xbf16> to vector<64x147xbf16>
    %c0_3 = arith.constant 0 : index
    %c0_4 = arith.constant 0 : index
    %2 = vector.load %arg2[%c0_3, %c0_4] : memref<147x128xbf16, #tpu.memory_space<vmem>>, vector<147x128xbf16>
    %cst = arith.constant dense<0.000000e+00> : vector<64x128xf32>
    %3 = tpu.matmul %1, %2, %cst {dimension_numbers = #tpu.dot_dimension_numbers<[1], [0], [0], [1], [0, 0, 1, 1], [], []>} : vector<64x147xbf16>, vector<147x128xbf16>, vector<64x128xf32> -> vector<64x128xf32>
    %c0_5 = arith.constant 0 : index
    %c0_6 = arith.constant 0 : index
    %4 = vector.load %arg3[%c0_5, %c0_6] : memref<1x128xf32, #tpu.memory_space<vmem>>, vector<1x128xf32>
    %5 = vector.broadcast %4 : vector<1x128xf32> to vector<64x128xf32>
    %6 = arith.addf %3, %5 : vector<64x128xf32>
    %cst_7 = arith.constant 0.000000e+00 : f32
    %7 = vector.broadcast %cst_7 : f32 to vector<64x128xf32>
    %8 = arith.maximumf %6, %7 : vector<64x128xf32>
    %9 = vector.extract_strided_slice %8 {offsets = [0, 0], sizes = [16, 128], strides = [1, 1]} : vector<64x128xf32> to vector<16x128xf32>
    %10 = vector.extract_strided_slice %8 {offsets = [16, 0], sizes = [16, 128], strides = [1, 1]} : vector<64x128xf32> to vector<16x128xf32>
    %11 = vector.extract_strided_slice %8 {offsets = [32, 0], sizes = [16, 128], strides = [1, 1]} : vector<64x128xf32> to vector<16x128xf32>
    %12 = vector.extract_strided_slice %8 {offsets = [48, 0], sizes = [16, 128], strides = [1, 1]} : vector<64x128xf32> to vector<16x128xf32>
    %13 = tpu.iota {dimensions = array<i32: 0>} : vector<16x1xi32>
    %c4_i32 = arith.constant 4 : i32
    %c0_i32 = arith.constant 0 : i32
    %14 = arith.cmpi eq, %c4_i32, %c0_i32 : i32
    %c1_i32 = arith.constant 1 : i32
    %15 = arith.select %14, %c1_i32, %c4_i32 : i32
    %16 = vector.broadcast %15 : i32 to vector<16x1xi32>
    %17 = arith.remsi %13, %16 : vector<16x1xi32>
    %c0_i32_8 = arith.constant 0 : i32
    %18 = vector.broadcast %c0_i32_8 : i32 to vector<16x1xi32>
    %19 = arith.cmpi ne, %17, %18 : vector<16x1xi32>
    %c0_i32_9 = arith.constant 0 : i32
    %20 = vector.broadcast %c0_i32_9 : i32 to vector<16x1xi32>
    %21 = arith.cmpi slt, %17, %20 : vector<16x1xi32>
    %c0_i32_10 = arith.constant 0 : i32
    %22 = arith.cmpi slt, %15, %c0_i32_10 : i32
    %23 = vector.broadcast %22 : i1 to vector<16x1xi1>
    %24 = vector.broadcast %23 : vector<16x1xi1> to vector<16x1xi1>
    %25 = arith.xori %21, %24 : vector<16x1xi1>
    %26 = arith.andi %25, %19 : vector<16x1xi1>
    %27 = vector.broadcast %15 : i32 to vector<16x1xi32>
    %28 = arith.addi %17, %27 : vector<16x1xi32>
    %29 = arith.select %26, %28, %17 : vector<16x1xi1>, vector<16x1xi32>
    %c0_i32_11 = arith.constant 0 : i32
    %30 = vector.broadcast %c0_i32_11 : i32 to vector<16x1xi32>
    %31 = arith.cmpi ne, %29, %30 : vector<16x1xi32>
    %32 = arith.extui %31 : vector<16x1xi1> to vector<16x1xi32>
    %33 = arith.sitofp %32 : vector<16x1xi32> to vector<16x1xf32>
    %c16_i32 = arith.constant 16 : i32
    %c0_i32_12 = arith.constant 0 : i32
    %34 = arith.cmpi eq, %c16_i32, %c0_i32_12 : i32
    %c1_i32_13 = arith.constant 1 : i32
    %35 = arith.select %34, %c1_i32_13, %c16_i32 : i32
    %36 = vector.broadcast %35 : i32 to vector<16x1xi32>
    %37 = arith.remsi %13, %36 : vector<16x1xi32>
    %c0_i32_14 = arith.constant 0 : i32
    %38 = vector.broadcast %c0_i32_14 : i32 to vector<16x1xi32>
    %39 = arith.cmpi ne, %37, %38 : vector<16x1xi32>
    %c0_i32_15 = arith.constant 0 : i32
    %40 = vector.broadcast %c0_i32_15 : i32 to vector<16x1xi32>
    %41 = arith.cmpi slt, %37, %40 : vector<16x1xi32>
    %c0_i32_16 = arith.constant 0 : i32
    %42 = arith.cmpi slt, %35, %c0_i32_16 : i32
    %43 = vector.broadcast %42 : i1 to vector<16x1xi1>
    %44 = vector.broadcast %43 : vector<16x1xi1> to vector<16x1xi1>
    %45 = arith.xori %41, %44 : vector<16x1xi1>
    %46 = arith.andi %45, %39 : vector<16x1xi1>
    %47 = vector.broadcast %35 : i32 to vector<16x1xi32>
    %48 = arith.addi %37, %47 : vector<16x1xi32>
    %49 = arith.select %46, %48, %37 : vector<16x1xi1>, vector<16x1xi32>
    %c4_i32_17 = arith.constant 4 : i32
    %50 = vector.broadcast %c4_i32_17 : i32 to vector<16x1xi32>
    %51 = arith.cmpi sge, %49, %50 : vector<16x1xi32>
    %52 = arith.extui %51 : vector<16x1xi1> to vector<16x1xi32>
    %53 = arith.sitofp %52 : vector<16x1xi32> to vector<16x1xf32>
    %c1_i32_18 = arith.constant 1 : i32
    %54 = tpu.dynamic_rotate %10 by %c1_i32_18 dim 0 : vector<16x128xf32>, i32 -> vector<16x128xf32>
    %55 = vector.broadcast %33 : vector<16x1xf32> to vector<16x128xf32>
    %56 = arith.mulf %54, %55 : vector<16x128xf32>
    %c1_i32_19 = arith.constant 1 : i32
    %57 = tpu.dynamic_rotate %12 by %c1_i32_19 dim 0 : vector<16x128xf32>, i32 -> vector<16x128xf32>
    %58 = vector.broadcast %33 : vector<16x1xf32> to vector<16x128xf32>
    %59 = arith.mulf %57, %58 : vector<16x128xf32>
    %c4_i32_20 = arith.constant 4 : i32
    %60 = tpu.dynamic_rotate %11 by %c4_i32_20 dim 0 : vector<16x128xf32>, i32 -> vector<16x128xf32>
    %61 = vector.broadcast %53 : vector<16x1xf32> to vector<16x128xf32>
    %62 = arith.mulf %60, %61 : vector<16x128xf32>
    %c4_i32_21 = arith.constant 4 : i32
    %63 = tpu.dynamic_rotate %12 by %c4_i32_21 dim 0 : vector<16x128xf32>, i32 -> vector<16x128xf32>
    %64 = vector.broadcast %53 : vector<16x1xf32> to vector<16x128xf32>
    %65 = arith.mulf %63, %64 : vector<16x128xf32>
    %c4_i32_22 = arith.constant 4 : i32
    %66 = tpu.dynamic_rotate %59 by %c4_i32_22 dim 0 : vector<16x128xf32>, i32 -> vector<16x128xf32>
    %67 = vector.broadcast %53 : vector<16x1xf32> to vector<16x128xf32>
    %68 = arith.mulf %66, %67 : vector<16x128xf32>
    %69 = arith.maximumf %9, %10 : vector<16x128xf32>
    %70 = arith.maximumf %69, %11 : vector<16x128xf32>
    %71 = arith.maximumf %70, %12 : vector<16x128xf32>
    %72 = arith.maximumf %71, %56 : vector<16x128xf32>
    %73 = arith.maximumf %72, %59 : vector<16x128xf32>
    %74 = arith.maximumf %73, %62 : vector<16x128xf32>
    %75 = arith.maximumf %74, %65 : vector<16x128xf32>
    %76 = arith.maximumf %75, %68 : vector<16x128xf32>
    %c0_23 = arith.constant 0 : index
    %c0_24 = arith.constant 0 : index
    %77 = vector.load %arg4[%c0_23, %c0_24] : memref<16x128xf32, #tpu.memory_space<vmem>>, vector<16x128xf32>
    tpu.vector_store %arg4[%c0_23, %c0_24], %76 {strides = array<i32>} : memref<16x128xf32, #tpu.memory_space<vmem>>, vector<16x128xf32>,
    return
  }
  func.func @transform_0(%arg0: i32) -> (i32, i32, i32, i32) {
    %c0_i32 = arith.constant 0 : i32
    %c0_i32_0 = arith.constant 0 : i32
    %c0_i32_1 = arith.constant 0 : i32
    %c0_i32_2 = arith.constant 0 : i32
    return %c0_i32, %arg0, %c0_i32_0, %c0_i32_1 : i32, i32, i32, i32
  }
  func.func @transform_1(%arg0: i32) -> (i32, i32) {
    %c0_i32 = arith.constant 0 : i32
    %c0_i32_0 = arith.constant 0 : i32
    %c0_i32_1 = arith.constant 0 : i32
    return %c0_i32, %c0_i32_0 : i32, i32
  }
  func.func @transform_2(%arg0: i32) -> (i32, i32) {
    %c0_i32 = arith.constant 0 : i32
    %c0_i32_0 = arith.constant 0 : i32
    %c0_i32_1 = arith.constant 0 : i32
    return %c0_i32, %c0_i32_0 : i32, i32
  }
  func.func @transform_3(%arg0: i32) -> (i32, i32) {
    %c0_i32 = arith.constant 0 : i32
    %c0_i32_0 = arith.constant 0 : i32
    return %arg0, %c0_i32 : i32, i32
  }
}

</mosaic_0001>

<bundles_post_ra>
// kernel: tpu_custom_call.1
= control target key start
LH: loop header
LB: loop body
LE: loop exit
PB: predicated region body
PF: predicated region fallthrough
CT: control target
= control target key end

     0   :  { %8 = vsyncpa [#allocation3], 0  ;;  %s1184_s0 = inlined_call_operand.hbm [shape: bf16[4,2,16,147], index: 0, kind: input, shape index: {}]   ;;  %s1185_s1 = inlined_call_operand.hbm [shape: bf16[147,128], index: 1, kind: input, shape index: {}]   ;;  %s1186_s2 = inlined_call_operand.vmem [shape: f32[1,128], index: 2, kind: input, shape index: {}]   ;;  %s1187_s3 = inlined_call_operand.hbm [shape: f32[32,128], index: 3, kind: output, shape index: {}]  }
   0x1   :  { %10 = vsyncpa [#allocation3 + $0x1], 0 }
   0x2   :  { %11 = vsyncpa [#allocation6], 0 }
   0x3   :  { %12 = vsyncpa [#allocation4], 0 }
   0x4   :  { %14 = vsyncpa [#allocation4 + $0x1], 0  ;;  %s956_s12 = smov 0   ;;  %s958_s13 = smov 0  }
   0x5   :  { %s960_s14 = smov 0   ;;  %s962_s15 = smov 0  }
   0x6 LB: > { %s977_s16 = sadd.s32 4294967295, %s919_s15   ;;  %s661_s17 = sadd.s32 4294967294, %s919_s15   ;;  %s919_s15 = sphi %s962_s15, %s1211_s15   ;;  %s915_s14 = sphi %s960_s14, %s1210_s14   ;;  %s911_s13 = sphi %s958_s13, %s1209_s13   ;;  %s907_s12 = sphi %s956_s12, %s1208_s12  }
   0x7   : > { %s981_s18 = sadd.s32 1, %s919_s15   ;;  %s27_s19 = sadd.s32 1, %s915_s14 }
   0x8   : > { %s24_s20 = ssub.s32 %s919_s15, %s981_s18  ;;  %p34_p0 = scmp.ne.s32.totalorder %s915_s14, %s911_s13 }
   0x9   : > { %p25_p1 = scmp.eq.s32.totalorder %s24_s20, 0  ;;  %p35_p2 = scmp.eq.s32.totalorder %s919_s15, 0 }
   0xa   : > { %p40_p3 = scmp.ne.s32.totalorder %s911_s13, %s907_s12  ;;  %p1188_p4 = scmp.eq.s32.totalorder %s977_s16, 0 }
   0xb   : > { %s993_s21 = scalar_select %p25_p1, %s915_s14, %s27_s19  }
   0xc   : > { %p995_p5 = por %p35_p2, %p34_p0  ;;  %p1001_p6 = por %p1188_p4, %p40_p3 }
   0xd   : > { %p106_p7 = scmp.eq.s32.totalorder %s977_s16, 1  ;;  %p112_p8 = scmp.eq.s32.totalorder %s661_s17, 1 }
   0xe   : > { %s1193_s22 = scalar_select %p995_p5, 1, 0 }
   0xf   : > { %s1194_s23 = scalar_select %p1001_p6, 1, 0 }
  0x10   : > { %p662_p9 = scmp.ge.s32.totalorder %s919_s15, 1  ;;  %p119_p10 = scmp.lt.s32.totalorder %s919_s15, 3 }
  0x11   : > { %p1008_p11 = por %p106_p7, %p34_p0  ;;  %p1012_p12 = por %p112_p8, %p40_p3 }
  0x12   : > { %p1016_p13 = pnand %p662_p9, %p119_p10  ;;  %s921_s27 = smov [#allocation5]  }
  0x13   : > { %s1195_s24 = scalar_select %p1008_p11, 1, 0 }
  0x14   : > { %s1196_s25 = scalar_select %p1012_p12, 1, 0 }
  0x15   : > { %s1197_s26 = scalar_select %p1016_p13, 1, 0 }
  0x16   : > { %p742_p1 = pneg %p1016_p13  ;;  %s131_s28 = sshll.u32 %s921_s27, 4  ;;  %s132_s28 = int_to_ptr.vmem [resolvable:$true] %s131_s28 }
  0x17   : > { %s821_s5 = scalar_lea.hbm %s1185_s1, 1216 }
  0x18   : > { %p1024_p2 = pnand %p742_p1, %p1188_p4  ;;  %p822_p0 = scmp.ne.s32.totalorder %s1185_s1, %s821_s5 }
  0x19   : > { %p828_p9 = scmp.lt.u32.totalorder %s821_s5, %s1185_s1 }
  0x1a   : > { %p823_p3 = pneg %p1024_p2 }
  0x1c   : > { %p824_p7 = pnand %p823_p3, %p822_p0 }
  0x1e   : > { %p825_p8 = pneg %p824_p7 }
  0x20   : > { %p830_p10 = pnand %p828_p9, %p825_p8 }
  0x22   : > { %833 = shalt.err (!%p830_p10)
}
  0x23   : > { %s834_s10 = scalar_lea.vmem %s132_s28, 1216  ;;  %p842_p11 = scmp.lt.s32.totalorder %s132_s28, %s132_s28 }
  0x24   : > { %p835_p1 = scmp.ne.s32.totalorder %s132_s28, %s834_s10  ;;  %p843_p6 = scmp.lt.s32.totalorder %s834_s10, %s834_s10 }
  0x26   : > { %p837_p4 = pnand %p835_p1, %p823_p3  ;;  %p844_p13 = por %p843_p6, %p842_p11 }
  0x28   : > { %p838_p12 = pneg %p837_p4 }
  0x2a   : > { %p845_p5 = pnand %p844_p13, %p838_p12 }
  0x2c   : > { %848 = shalt.err (!%p845_p5)
}
  0x2d   : > { %s922_s11 = smov 64   ;;  %s923_s17 = smov 4  }
  0x2e   : > { %745 = dma.hbm_to_vmem [thread:$0]  (!%p1024_p2), %s1185_s1, 1216, %s132_s28, [#allocation6], %s922_s11, %s922_s11, %s923_s17  }
  0x2f   : > { %p664_p0 = scmp.ge.s32.totalorder %s919_s15, 2 }
  0x31   : > { %144 = sbr.rel (%p664_p0) target bundleno = 71 (0x47), region = 24 }
  0x38   : > { %s148_s27 = sand.u32 1, %s915_s14   ;;  %s705_s30 = sshll.u32 %s919_s15, 8 }
  0x39   : > { %s665_s29 = sshll.u32 %s148_s27, 6  ;;  %s158_s28 = scalar_lea.hbm %s1184_s0, %s705_s30 }
  0x3a   : > { %p1199_p4 = scmp.ne.s32.totalorder %s1193_s22, 0  ;;  %s152_s7 = scalar_lea.vmem [#allocation2], %s665_s29 }
  0x3b   : > { %s171_s8 = sshll.u32 %s152_s7, 4  ;;  %s924_s10 = smov 512   ;;  %s172_s8 = int_to_ptr.vmem [resolvable:$true] %s171_s8 }
  0x3c   : > { %s729_s6 = scalar_select %p1199_p4, [#allocation0], [#allocation10] }
  0x3d   : > { %730 = sst [smem:[#allocation9]] (%p1199_p4), %s924_s10  ;;  %s925_s11 = smov 256  }
  0x3e   : > { %s163_s9 = sld [smem:[%s729_s6]]   ;;  %s926_s17 = smov 2  }
  0x3f   : > { %731 = sst [smem:[#allocation9 + $0x1]] (%p1199_p4), %s925_s11  ;;  %s927_s19 = smov 128  }
  0x40   : > { %732 = sst [smem:[#allocation9 + $0x2]] (%p1199_p4), %s926_s17  ;;  %s928_s30 = smov 8  }
  0x41   : > { %733 = sst [smem:[#allocation9 + $0x3]] (%p1199_p4), %s927_s19  ;;  %s149_s4 = scalar_lea.sflag [#allocation3], %s148_s27 }
  0x42   : > { %734 = sst [smem:[#allocation9 + $0x4]] (%p1199_p4), %s927_s19  ;;  %s929_s5 = smov [#allocation8]  }
  0x43   : > { %735 = sst [smem:[#allocation9 + $0x5]] (%p1199_p4), %s928_s30 }
  0x44   : > { %s668_s20 = sshll.u32 %s163_s9, 26 }
  0x45   : > { %s669_s29 = sadd.s32 134217728, %s668_s20 }
  0x46   : > { %736 = dma.general (%p1199_p4), %s158_s28, 1024, %s172_s8, %s149_s4, %s929_s5, [#allocation9], %s669_s29, 0  }
  0x47 PF: > { %p1200_p5 = scmp.ne.s32.totalorder %s1197_s26, 0 }
  0x48   : > { %s1071_s6 = sand.u32 (!%p1200_p5), 1, %s911_s13   ;;  %p1201_p6 = scmp.ne.s32.totalorder (!%p1200_p5), %s1194_s23, 0 }
  0x49   : > { %196 = sbr.rel (%p1200_p5) target bundleno = 383 (0x17f), region = 32  ;;  %s671_s7 = sshll.u32 (!%p1200_p5), %s1071_s6, 6 }
  0x4a   : > { %s199_s9 = scalar_lea.sflag (!%p1200_p5), [#allocation3], %s1071_s6  ;;  %s1075_s10 = scalar_lea.vmem (!%p1200_p5), [#allocation2], %s671_s7 }
  0x50   : > { %894 = dma.done.wait (%p1201_p6), %s199_s9, 1024  }
  0x51   : > { %896 = vsyncadd (%p1201_p6), %s199_s9, 4294966272  ;;  %p1202_p11 = scmp.eq.s32.totalorder %s977_s16, 0 }
  0x53   : > { %898 = dma.done.wait (%p1202_p11), [#allocation6], 1216   ;;  %p1203_p12 = pmov %p1202_p11 }
  0x54   : > { %v930_v0 = vmov 0   ;;  %v799_v1 = vld [vmem:[#allocation5] sm:$0xff]   ;;  %v800_v2 = vld [vmem:[#allocation5 + $0x8] sm:$0xff]   ;;  %v801_v3 = vld [vmem:[#allocation5 + $0x10] sm:$0xff]   ;;  %vm358_vm0 = vcmask 154624   ;;  %vm371_vm1 = vcmask 1040384   ;;  %v451_v23 = vlaneseq }
  0x55   : > { %900 = vsyncadd (%p1203_p12), [#allocation6], 4294966080  ;;  %378 = vmatprep.subr.bf16.mxu0 %v930_v0  ;;  %707 = vmatprep.subr.bf16.mxu1 %v930_v0  ;;  %v802_v4 = vld [vmem:[#allocation5 + $0x18] sm:$0xff]   ;;  %v811_v5 = vld [vmem:[%s1075_s10 + $0x4] ss:$8 sps:$4 sm:$0xff]   ;;  %vm372_vm2 = vcmask 1041408  }
  0x56   : > { %379 = vmatpush1.bf16.msra.mxu0 %v799_v1  ;;  %717 = vmatpush1.bf16.msra.mxu1 %v799_v1  ;;  %v814_v6 = vld [vmem:[%s1075_s10 + $0x24] ss:$8 sps:$4 sm:$0xff]   ;;  %v805_v9 = vld [vmem:[#allocation5 + $0x30] sm:$0xff]   ;;  %v806_v10 = vld [vmem:[#allocation5 + $0x38] sm:$0xff]   ;;  %v931_v11 = vmov 65535   ;;  %v1100_v32 = vshrl.u32 %v451_v23, 7 }
  0x57   : > { %380 = vmatprep.subr.bf16.mxu0 %v930_v0  ;;  %708 = vmatprep.subr.bf16.mxu1 %v930_v0  ;;  %v803_v7 = vld [vmem:[#allocation5 + $0x20] sm:$0xff]   ;;  %v804_v8 = vld [vmem:[#allocation5 + $0x28] sm:$0xff]   ;;  %v373_v12 = vsel %vm371_vm1, 4294967295, %v931_v11  ;;  %v815_v19 = vld [vmem:[%s1075_s10 + $0x14] ss:$8 sps:$4 sm:$0xff]   ;;  %v932_v1 = vmov 0.0  }
  0x58   : > { %693 = vmatprep.mubr.msk.bf16.mxu0 %vm358_vm0, %v811_v5  ;;  %695 = vmatprep.mubr.msk.bf16.mxu1 %vm358_vm0, %v814_v6  ;;  %v807_v13 = vld [vmem:[#allocation5 + $0x40] sm:$0xff]   ;;  %v808_v14 = vld [vmem:[#allocation5 + $0x48] ss:$0 sps:$4 sm:$0x33]   ;;  %v374_v15 = vsel %vm372_vm2, %v373_v12, 0  ;;  %v453_v37 = vadd.s32 8, %v1100_v32 }
  0x59   : > { %v376_v16 = vand.u32 %v808_v14, %v374_v15  ;;  %v809_v17 = vld [vmem:[%s1075_s10] ss:$8 sps:$4 sm:$0xff]   ;;  %v817_v20 = vld [vmem:[%s1075_s10 + $0x34] ss:$8 sps:$4 sm:$0xff]   ;;  %v819_v21 = vld [vmem:[%s1075_s10 + $0x10] ss:$8 sps:$4 sm:$0xff]  }
  0x5a   : > { %381 = vmatpush1.bf16.msra.mxu0 %v800_v2  ;;  %718 = vmatpush1.bf16.msra.mxu1 %v800_v2  ;;  %v812_v18 = vld [vmem:[%s1075_s10 + $0x20] ss:$8 sps:$4 sm:$0xff]   ;;  %v820_v22 = vld [vmem:[%s1075_s10 + $0x30] ss:$8 sps:$4 sm:$0xff]   ;;  %vm529_vm3 = vcmp.lt.s32.totalorder %v1100_v32, 4  ;;  %v458_v41 = vand.u32 3, %v1100_v32 }
  0x5b   : > { %382 = vmatprep.subr.bf16.mxu0 %v930_v0  ;;  %709 = vmatprep.subr.bf16.mxu1 %v930_v0  ;;  %v674_v24 = vld [vmem:[%s1186_s2] ss:$0 sm:$0xff]  ;;  %v488_v43 = vand.u32 15, %v1100_v32  ;;  %v465_v46 = vand.u32 3, %v453_v37  ;;  %vm516_vm7 = vcmp.lt.s32.totalorder %v1100_v32, 1  ;;  %s673_s26 = sshll.u32 %s1071_s6, 4 }
  0x5c   : > { %vm478_vm4 = vcmp.ne.s32.totalorder %v458_v41, 0  ;;  %s706_s27 = sshll.u32 %s977_s16, 8  ;;  %s228_s28 = scalar_lea.vmem [#allocation7], %s673_s26 }
  0x5d   : > { %vm479_vm5 = vcmp.ne.s32.totalorder %v465_v46, 0  ;;  %vm1110_vm6 = vcmp.ge.s32.totalorder %v488_v43, 4  ;;  %v697_v2 = vsel %vm478_vm4, 1.0, %v932_v1  ;;  %s578_s8 = sshll.u32 %s228_s28, 4  ;;  %s1138_s19 = scalar_lea.hbm %s1187_s3, %s706_s27  ;;  %s1140_s8 = int_to_ptr.vmem [resolvable:$true] %s578_s8 }
  0x5e   : > { %383 = vmatpush1.bf16.msra.mxu0 %v801_v3  ;;  %719 = vmatpush1.bf16.msra.mxu1 %v801_v3  ;;  %v699_v15 = vsel %vm1110_vm6, 1.0, %v932_v1  ;;  %s565_s16 = scalar_lea.sflag [#allocation4], %s1071_s6  ;;  %s849_s20 = scalar_lea.vmem %s1140_s8, 256 }
  0x5f   : > { %384 = vmatprep.subr.bf16.mxu0 %v930_v0  ;;  %710 = vmatprep.subr.bf16.mxu1 %v930_v0  ;;  %p850_p13 = scmp.ne.s32.totalorder %s1140_s8, %s849_s20  ;;  %p1206_p2 = scmp.ne.s32.totalorder %s1195_s24, 0 }
  0x60   : > { %s933_s30 = smov [#allocation7]  }
  0x61   : > { %p851_p3 = pnand %p850_p13, %p1206_p2  ;;  %s853_s29 = sshll.u32 %s933_s30, 4  ;;  %s854_s29 = int_to_ptr.vmem [resolvable:$false] %s853_s29 }
  0x62   : > { %385 = vmatpush1.bf16.msra.mxu0 %v802_v4  ;;  %720 = vmatpush1.bf16.msra.mxu1 %v802_v4  ;;  %s855_s4 = scalar_lea.vmem %s854_s29, 512  ;;  %p856_p8 = scmp.lt.s32.totalorder %s1140_s8, %s854_s29 }
  0x63   : > { %386 = vmatprep.subr.bf16.mxu0 %v930_v0  ;;  %711 = vmatprep.subr.bf16.mxu1 %v930_v0  ;;  %p852_p7 = pneg %p851_p3  ;;  %p857_p9 = scmp.lt.s32.totalorder %s855_s4, %s849_s20 }
  0x65   : > { %p858_p10 = por %p857_p9, %p856_p8 }
  0x66   : > { %387 = vmatpush1.bf16.msra.mxu0 %v803_v7  ;;  %721 = vmatpush1.bf16.msra.mxu1 %v803_v7 }
  0x67   : > { %388 = vmatprep.subr.bf16.mxu0 %v930_v0  ;;  %712 = vmatprep.subr.bf16.mxu1 %v930_v0  ;;  %p859_p1 = pnand %p858_p10, %p852_p7 }
  0x6a   : > { %389 = vmatpush1.bf16.msra.mxu0 %v804_v8  ;;  %722 = vmatpush1.bf16.msra.mxu1 %v804_v8 }
  0x6b   : > { %390 = vmatprep.subr.bf16.mxu0 %v930_v0  ;;  %713 = vmatprep.subr.bf16.mxu1 %v930_v0 }
  0x6e   : > { %391 = vmatpush1.bf16.msra.mxu0 %v805_v9  ;;  %723 = vmatpush1.bf16.msra.mxu1 %v805_v9 }
  0x6f   : > { %392 = vmatprep.subr.bf16.mxu0 %v930_v0  ;;  %714 = vmatprep.subr.bf16.mxu1 %v930_v0 }
  0x72   : > { %393 = vmatpush1.bf16.msra.mxu0 %v806_v10  ;;  %724 = vmatpush1.bf16.msra.mxu1 %v806_v10  ;;  %v698_v10 = vsel %vm479_vm5, 1.0, %v932_v1 }
  0x73   : > { %394 = vmatprep.subr.bf16.mxu0 %v930_v0  ;;  %715 = vmatprep.subr.bf16.mxu1 %v930_v0 }
  0x76   : > { %395 = vmatpush1.bf16.msra.mxu0 %v807_v13  ;;  %725 = vmatpush1.bf16.msra.mxu1 %v807_v13 }
  0x77   : > { %396 = vmatprep.subr.bf16.mxu0 %v930_v0  ;;  %716 = vmatprep.subr.bf16.mxu1 %v930_v0 }
  0x7a   : > { %397 = vmatpush1.bf16.msra.mxu0 %v376_v16  ;;  %726 = vmatpush1.bf16.msra.mxu1 %v376_v16 }
  0x7d   : > { %411 = vmatmul.mubr.bf16.vlgmr.msra.gmra.mrb[0].mxu0 %v809_v17  ;;  %427 = vmatmul.mubr.bf16.vlgmr.msra.gmra.mrb[0].mxu1 %v812_v18 }
  0x7e   : > { %694 = vmatprep.mubr.msk.bf16.mxu0 %vm358_vm0, %v815_v19  ;;  %696 = vmatprep.mubr.msk.bf16.mxu1 %vm358_vm0, %v817_v20 }
  0x85   : > { %419 = vmatmul.mubr.bf16.gmra.mrb[4].mxu0 %v819_v21  ;;  %435 = vmatmul.mubr.bf16.gmra.mrb[4].mxu1 %v820_v22 }
 0x150   : > { %v412_v25 = vpop.f32.mrb[0].mxu0  ;;  %v428_v26 = vpop.f32.mrb[0].mxu1 }
 0x151   : > { %v429_v27 = vadd.f32 %v674_v24, %v428_v26  ;;  %v414_v28 = vpop.f32.mrb[1].mxu0  ;;  %v430_v29 = vpop.f32.mrb[1].mxu1  ;;  %v413_v40 = vadd.f32 %v674_v24, %v412_v25 }
 0x152   : > { %v415_v30 = vpop.f32.mrb[2].mxu0  ;;  %v431_v31 = vpop.f32.mrb[2].mxu1 }
 0x153   : > { %v447_v33 = vmax.f32 %v429_v27, 0.0  ;;  %v432_v34 = vadd.f32 %v674_v24, %v431_v31  ;;  %v417_v35 = vpop.f32.mrb[3].mxu0  ;;  %v433_v36 = vpop.f32.mrb[3].mxu1  ;;  %v443_v53 = vmax.f32 %v413_v40, 0.0  ;;  %v416_v54 = vadd.f32 %v674_v24, %v415_v30 }
 0x155   : > { %v527_v38 = vrot.slane %v447_v33, 4  ;;  %v448_v39 = vmax.f32 %v432_v34, 0.0  ;;  %v444_v3 = vmax.f32 %v416_v54, 0.0 }
 0x157   : > { %v528_v42 = vrot.slane %v448_v39, 4 }
 0x158   : > { %v420_v44 = vpop.f32.mrb[4].mxu0  ;;  %v436_v45 = vpop.f32.mrb[4].mxu1 }
 0x159   : > { %v530_v47 = vsel %vm529_vm3, %v527_v38, %v528_v42  ;;  %v531_v48 = vsel %vm529_vm3, %v528_v42, %v527_v38  ;;  %v421_v49 = vadd.f32 %v674_v24, %v420_v44  ;;  %v437_v50 = vadd.f32 %v674_v24, %v436_v45  ;;  %v422_v51 = vpop.f32.mrb[5].mxu0  ;;  %v438_v52 = vpop.f32.mrb[5].mxu1 }
 0x15a   : > { %v423_v55 = vpop.f32.mrb[6].mxu0  ;;  %v439_v56 = vpop.f32.mrb[6].mxu1  ;;  %v532_v34 = vmul.f32 %v699_v15, %v531_v48 }
 0x15b   : > { %v445_v57 = vmax.f32 %v421_v49, 0.0  ;;  %v449_v58 = vmax.f32 %v437_v50, 0.0  ;;  %v424_v59 = vadd.f32 %v674_v24, %v423_v55  ;;  %v440_v60 = vadd.f32 %v674_v24, %v439_v56  ;;  %v425_v61 = vpop.f32.mrb[7].mxu0  ;;  %v441_v62 = vpop.f32.mrb[7].mxu1 }
 0x15d   : > { %v546_v0 = vmax.f32 %v443_v53, %v445_v57  ;;  %v521_v4 = vrot.slane %v449_v58, 7  ;;  %v446_v5 = vmax.f32 %v424_v59, 0.0  ;;  %v450_v6 = vmax.f32 %v440_v60, 0.0 }
 0x15e   : > { %v514_v7 = vrot.slane %v445_v57, 7  ;;  %v534_v9 = vrot.slane %v449_v58, 4 }
 0x15f   : > { %v548_v8 = vmax.f32 %v546_v0, %v447_v33  ;;  %v515_v11 = vrot.slane %v446_v5, 7  ;;  %v547_v12 = vmax.f32 %v444_v3, %v446_v5  ;;  %v522_v13 = vrot.slane %v450_v6, 7 }
 0x160   : > { %v535_v14 = vrot.slane %v450_v6, 4 }
 0x161   : > { %v550_v16 = vmax.f32 %v548_v8, %v449_v58  ;;  %v517_v17 = vsel %vm516_vm7, %v514_v7, %v515_v11  ;;  %v518_v18 = vsel %vm516_vm7, %v515_v11, %v514_v7  ;;  %v549_v19 = vmax.f32 %v547_v12, %v448_v39 }
 0x162   : > { %v523_v20 = vsel %vm516_vm7, %v521_v4, %v522_v13  ;;  %v519_v21 = vmul.f32 %v697_v2, %v518_v18  ;;  %v520_v22 = vmul.f32 %v698_v10, %v517_v17  ;;  %v524_v23 = vsel %vm516_vm7, %v522_v13, %v521_v4 }
 0x163   : > { %v526_v24 = vmul.f32 %v698_v10, %v523_v20  ;;  %v525_v25 = vmul.f32 %v697_v2, %v524_v23  ;;  %v536_v26 = vsel %vm529_vm3, %v534_v9, %v535_v14  ;;  %v537_v27 = vsel %vm529_vm3, %v535_v14, %v534_v9 }
 0x164   : > { %v551_v28 = vmax.f32 %v549_v19, %v450_v6  ;;  %v552_v29 = vmax.f32 %v550_v16, %v519_v21  ;;  %v538_v39 = vmul.f32 %v699_v15, %v537_v27 }
 0x165   : > { %v541_v30 = vrot.slane %v526_v24, 4  ;;  %v540_v31 = vrot.slane %v525_v25, 4 }
 0x166   : > { %v553_v33 = vmax.f32 %v551_v28, %v520_v22  ;;  %v554_v35 = vmax.f32 %v552_v29, %v525_v25 }
 0x167   : > { %v542_v36 = vsel %vm529_vm3, %v540_v31, %v541_v30  ;;  %v543_v37 = vsel %vm529_vm3, %v541_v30, %v540_v31 }
 0x168   : > { %v555_v38 = vmax.f32 %v553_v33, %v526_v24  ;;  %v556_v40 = vmax.f32 %v554_v35, %v532_v34  ;;  %v544_v42 = vmul.f32 %v699_v15, %v543_v37 }
 0x16a   : > { %v557_v41 = vmax.f32 %v555_v38, %v530_v47  ;;  %v558_v43 = vmax.f32 %v556_v40, %v538_v39 }
 0x16c   : > { %v559_v44 = vmax.f32 %v557_v41, %v536_v26  ;;  %v560_v45 = vmax.f32 %v558_v43, %v544_v42 }
 0x16e   : > { %v561_v32 = vmax.f32 %v559_v44, %v542_v36  ;;  %562 = vst [vmem:[%s228_s28] sm:$0xff] %v560_v45 }
 0x170   : > { %563 = vst [vmem:[%s228_s28 + $0x8] sm:$0xff] %v561_v32 }
 0x171   : > { %862 = shalt.err (!%p859_p1)
}
 0x172   : > { %s863_s5 = scalar_lea.hbm %s1138_s19, 256  ;;  %s867_s10 = scalar_lea.hbm %s1187_s3, 512 }
 0x173   : > { %p864_p4 = scmp.ne.s32.totalorder %s1138_s19, %s863_s5  ;;  %p868_p11 = scmp.lt.u32.totalorder %s1138_s19, %s1187_s3 }
 0x174   : > { %p869_p12 = scmp.lt.u32.totalorder %s867_s10, %s863_s5  ;;  %p871_p3 = scmp.lt.u32.totalorder %s863_s5, %s1138_s19 }
 0x175   : > { %p865_p5 = pnand %p864_p4, %p1206_p2 }
 0x176   : > { %p870_p13 = por %p869_p12, %p868_p11 }
 0x177   : > { %p866_p6 = pneg %p865_p5 }
 0x178   : > { %p872_p7 = por %p871_p3, %p870_p13 }
 0x17a   : > { %p873_p8 = pnand %p872_p7, %p866_p6 }
 0x17c   : > { %876 = shalt.err (!%p873_p8)
}
 0x17d   : > { %s934_s26 = smov 128   ;;  %s935_s27 = smov 8  }
 0x17e   : > { %740 = dma.vmem_to_hbm [thread:$0]  (%p1206_p2), %s1140_s8, 256, %s1138_s19, %s565_s16, %s934_s26, %s934_s26, %s935_s27  }
 0x17f PF: > { %s593_s28 = sand.u32 1, %s907_s12   ;;  %p1207_p9 = scmp.ne.s32.totalorder %s1196_s25, 0 }
 0x180   : > { %s594_s11 = scalar_lea.sflag [#allocation4], %s593_s28 }
 0x181   : > { %p747_p10 = pnand %p664_p0, %p1207_p9 }
 0x183   : > { %902 = dma.done.wait (!%p747_p10), %s594_s11, 256  }
 0x184   : > { %904 = vsyncadd (!%p747_p10), %s594_s11, 4294967040  ;;  %p17_p1 = scmp.ge.s32.totalorder %s981_s18, 4   ;;  %s1208_s12 = smov %s911_s13 }
 0x185   : > { %s1209_s13 = smov %s915_s14  ;;  %s1210_s14 = smov %s993_s21 }
 0x186   : > { %s1211_s15 = smov %s981_s18  ;;  %19 = sbr.rel (!%p17_p1) target bundleno = 6 (0x6), region = 86 }
 0x18d   :  { %599 = vsyncpa [#allocation3], 1 }
 0x18e   :  { %601 = vsyncpa [#allocation3 + $0x1], 1 }
 0x18f   :  { %602 = vsyncpa [#allocation6], 1 }
 0x190   :  { %603 = vsyncpa [#allocation4], 1 }
 0x191   :  { %605 = vsyncpa [#allocation4 + $0x1], 1 }

</bundles_post_ra>
